<compile_context>
chip_gen: v5e
topology: v5e:2x2
jax: 0.10.0
libtpu: 0.0.40
codegen_flags: <defaults>
</compile_context>

<pallas_src>
import jax
import jax.numpy as jnp
from jax.experimental import pallas as pl
from jax.experimental.pallas import tpu as pltpu


def _round_up(n: int, m: int) -> int:
    return ((n + m - 1) // m) * m


def _nbytes(a) -> int:
    return a.size * a.dtype.itemsize


def mlp_kernel(x_ref, w1_ref, b1_ref, w2_ref, b2_ref, w3_ref, b3_ref, o_ref):
    # bf16 MXU matmuls, f32 accumulation, f32 epilogue.
    h1 = jnp.dot(x_ref[...], w1_ref[...], preferred_element_type=jnp.float32)
    h1 = jnp.maximum(h1 + b1_ref[...], 0.0)

    h2 = jnp.dot(h1.astype(jnp.bfloat16), w2_ref[...],
                 preferred_element_type=jnp.float32)
    h2 = jnp.maximum(h2 + b2_ref[...], 0.0)

    h3 = jnp.dot(h2.astype(jnp.bfloat16), w3_ref[...],
                 preferred_element_type=jnp.float32)

    # Compute lane-dense (w3 padded to 128 cols), store only the real columns
    # (narrow masked vst; DMA writeback shrinks 64x vs a padded f32 slab).
    out_dim = o_ref.shape[-1]
    o_ref[...] = (h3[:, :out_dim] + b3_ref[...]).astype(o_ref.dtype)


def prepare_params(w1, b1, w2, b2, w3, b3):
    """One-time weight prep (pad + bf16 cast). Call once at init, not per forward.

    w*: (in_features, out_features) f32 (transposed vs PyTorch), b*: (out_features,) or (1, out_features).
    """
    in_dim, hidden = w1.shape
    out_dim = w3.shape[1]
    k_pad = _round_up(in_dim, 128)
    out_pad = _round_up(out_dim, 128)

    bf16, f32 = jnp.bfloat16, jnp.float32
    w1p = jnp.pad(w1.astype(bf16), ((0, k_pad - in_dim), (0, 0)))
    w2p = w2.astype(bf16)
    w3p = jnp.pad(w3.astype(bf16), ((0, 0), (0, out_pad - out_dim)))
    b1p = b1.reshape(1, hidden).astype(f32)
    b2p = b2.reshape(1, hidden).astype(f32)
    b3p = b3.reshape(1, out_dim).astype(f32)
    return (w1p, b1p, w2p, b2p, w3p, b3p)


def ann_forward(x, params):
    """x: (B, in_dim) f32; params: output of prepare_params. Returns (B, out_dim) f32."""
    w1p, b1p, w2p, b2p, w3p, b3p = params
    B, in_dim = x.shape
    k_pad, hidden = w1p.shape
    out_pad = w3p.shape[1]
    out_dim = b3p.shape[1]
    assert k_pad >= in_dim

    # ---- batch tile selection -------------------------------------------------
    if B <= 256:
        # Small-batch latency path: one tile, rounded to 16 rows (bf16 packs
        # (16,128) per vreg, so 8-row tiles leave packed sublanes half-empty).
        tb = _round_up(max(B, 1), 16)
    else:
        # Large batch: big tiles amortize the ~0.35 us per-grid-step overhead,
        # but keep >=2 steps so dimension_semantics=("parallel",) can split the
        # batch across v7x's two TensorCores. Cap at 2048 rows: x(bf16) + out
        # double buffers plus f32 h1/h2 scratch stay ~4-6 MiB, well under
        # v5e's 16 MiB default scoped VMEM (32 MiB on v6e/v7x).
        half = _round_up(pl.cdiv(B, 2), 256)
        tb = min(2048, half)
    b_pad = _round_up(B, tb)

    # Pad + cast x once (single pad HLO; bf16 halves the dominant HBM read).
    xp = jnp.pad(x.astype(jnp.bfloat16), ((0, b_pad - B), (0, k_pad - in_dim)))

    # Weights/biases: full-array blocks with constant index_map -> VMEM-resident
    # across all batch steps (they total < 200 KB).
    def resident(a):
        return pl.BlockSpec(a.shape, lambda i: tuple(0 for _ in a.shape))

    flops = 2 * b_pad * (k_pad * hidden + hidden * hidden + hidden * out_pad)
    bytes_accessed = (_nbytes(xp)
                      + sum(_nbytes(p) for p in params)
                      + b_pad * out_dim * 4)

    out = pl.pallas_call(
        mlp_kernel,
        out_shape=jax.ShapeDtypeStruct((b_pad, out_dim), jnp.float32),
        grid=(b_pad // tb,),
        in_specs=[
            pl.BlockSpec((tb, k_pad), lambda i: (i, 0)),   # x: batch-tiled, pipelined
            resident(w1p), resident(b1p),
            resident(w2p), resident(b2p),
            resident(w3p), resident(b3p),
        ],
        # Last block dim == full array dim (out_dim), so the narrow block is legal.
        out_specs=pl.BlockSpec((tb, out_dim), lambda i: (i, 0)),
        compiler_params=pltpu.CompilerParams(
            dimension_semantics=("parallel",),  # shard batch tiles across TCs (v7x)
        ),
        cost_estimate=pl.CostEstimate(
            flops=flops, transcendentals=0, bytes_accessed=bytes_accessed),
    )(xp, w1p, b1p, w2p, b2p, w3p, b3p)

    return out[:B]


def init_linear(key, in_dim, out_dim):
    # Mimic PyTorch nn.Linear default init: U(-1/sqrt(in_dim), 1/sqrt(in_dim)).
    kw, kb = jax.random.split(key)
    bound = 1.0 / jnp.sqrt(jnp.float32(in_dim))
    # Stored as (in_dim, out_dim) so the kernel can do x @ W.
    w = jax.random.uniform(kw, (in_dim, out_dim), jnp.float32, -bound, bound)
    b = jax.random.uniform(kb, (1, out_dim), jnp.float32, -bound, bound)
    return w, b


if __name__ == "__main__":
    input_dim, hidden_dim, output_dim = 200, 128, 2
    batch = 8

    key = jax.random.PRNGKey(0)
    kx, k1, k2, k3 = jax.random.split(key, 4)

    x = jax.random.normal(kx, (batch, input_dim), jnp.float32)
    w1, b1 = init_linear(k1, input_dim, hidden_dim)
    w2, b2 = init_linear(k2, hidden_dim, hidden_dim)
    w3, b3 = init_linear(k3, hidden_dim, output_dim)

    # One-time weight prep (hoisted out of the forward path).
    params = prepare_params(w1, b1, w2, b2, w3, b3)
    params = jax.block_until_ready(params)

    out = ann_forward(x, params)
    out = jax.block_until_ready(out)
    assert out.shape == (batch, output_dim)
    assert bool(jnp.all(jnp.isfinite(out)))

    # Reference 1: pure-JAX with the same bf16 matmul / f32 accumulation recipe.
    bf16 = jnp.bfloat16
    r = jnp.dot(x.astype(bf16), w1.astype(bf16), preferred_element_type=jnp.float32)
    r = jnp.maximum(r + b1, 0.0)
    r = jnp.dot(r.astype(bf16), w2.astype(bf16), preferred_element_type=jnp.float32)
    r = jnp.maximum(r + b2, 0.0)
    ref_bf16 = jnp.dot(r.astype(bf16), w3.astype(bf16), preferred_element_type=jnp.float32) + b3
    assert jnp.allclose(out, ref_bf16, atol=2e-2, rtol=2e-2)

    # Reference 2: full-f32 reference (looser tolerance due to bf16 matmul inputs).
    ref = jnp.maximum(x @ w1 + b1, 0.0)
    ref = jnp.maximum(ref @ w2 + b2, 0.0)
    ref = ref @ w3 + b3
    assert jnp.allclose(out, ref, atol=1e-1, rtol=5e-2)

    print("KERNEL_OK")
</pallas_src>

<mosaic_0001>
module attributes {stable_mosaic.version = 11 : i64} {
  func.func @mlp_kernel(%arg0: i32, %arg1: memref<16x256xbf16, #tpu.memory_space<vmem>>, %arg2: memref<256x128xbf16, #tpu.memory_space<vmem>>, %arg3: memref<1x128xf32, #tpu.memory_space<vmem>>, %arg4: memref<128x128xbf16, #tpu.memory_space<vmem>>, %arg5: memref<1x128xf32, #tpu.memory_space<vmem>>, %arg6: memref<128x128xbf16, #tpu.memory_space<vmem>>, %arg7: memref<1x2xf32, #tpu.memory_space<vmem>>, %arg8: memref<16x2xf32, #tpu.memory_space<vmem>>) attributes {dimension_semantics = [#tpu.dimension_semantics<parallel>], iteration_bounds = array<i64: 1>, scalar_prefetch = 0 : i64, scratch_operands = 0 : i64, tpu.core_type = #tpu.core_type<tc>, window_params = [{transform_indices = @transform_0, window_bounds = array<i64: 16, 256>}, {pipeline_mode = #tpu.pipeline_mode<synchronous>, transform_indices = @transform_1, window_bounds = array<i64: 256, 128>}, {pipeline_mode = #tpu.pipeline_mode<synchronous>, transform_indices = @transform_2, window_bounds = array<i64: 1, 128>}, {pipeline_mode = #tpu.pipeline_mode<synchronous>, transform_indices = @transform_3, window_bounds = array<i64: 128, 128>}, {pipeline_mode = #tpu.pipeline_mode<synchronous>, transform_indices = @transform_4, window_bounds = array<i64: 1, 128>}, {pipeline_mode = #tpu.pipeline_mode<synchronous>, transform_indices = @transform_5, window_bounds = array<i64: 128, 128>}, {pipeline_mode = #tpu.pipeline_mode<synchronous>, transform_indices = @transform_6, window_bounds = array<i64: 1, 2>}, {transform_indices = @transform_7, window_bounds = array<i64: 16, 2>}]} {
    %c0 = arith.constant 0 : index
    %c0_0 = arith.constant 0 : index
    %0 = vector.load %arg1[%c0, %c0_0] : memref<16x256xbf16, #tpu.memory_space<vmem>>, vector<16x256xbf16>
    %c0_1 = arith.constant 0 : index
    %c0_2 = arith.constant 0 : index
    %1 = vector.load %arg2[%c0_1, %c0_2] : memref<256x128xbf16, #tpu.memory_space<vmem>>, vector<256x128xbf16>
    %cst = arith.constant dense<0.000000e+00> : vector<16x128xf32>
    %2 = tpu.matmul %0, %1, %cst {dimension_numbers = #tpu.dot_dimension_numbers<[1], [0], [0], [1], [0, 0, 1, 1], [], []>} : vector<16x256xbf16>, vector<256x128xbf16>, vector<16x128xf32> -> vector<16x128xf32>
    %c0_3 = arith.constant 0 : index
    %c0_4 = arith.constant 0 : index
    %3 = vector.load %arg3[%c0_3, %c0_4] : memref<1x128xf32, #tpu.memory_space<vmem>>, vector<1x128xf32>
    %4 = vector.broadcast %3 : vector<1x128xf32> to vector<16x128xf32>
    %5 = arith.addf %2, %4 : vector<16x128xf32>
    %cst_5 = arith.constant 0.000000e+00 : f32
    %6 = vector.broadcast %cst_5 : f32 to vector<16x128xf32>
    %7 = arith.maximumf %5, %6 : vector<16x128xf32>
    %8 = arith.truncf %7 : vector<16x128xf32> to vector<16x128xbf16>
    %c0_6 = arith.constant 0 : index
    %c0_7 = arith.constant 0 : index
    %9 = vector.load %arg4[%c0_6, %c0_7] : memref<128x128xbf16, #tpu.memory_space<vmem>>, vector<128x128xbf16>
    %cst_8 = arith.constant dense<0.000000e+00> : vector<16x128xf32>
    %10 = tpu.matmul %8, %9, %cst_8 {dimension_numbers = #tpu.dot_dimension_numbers<[1], [0], [0], [1], [0, 0, 1, 1], [], []>} : vector<16x128xbf16>, vector<128x128xbf16>, vector<16x128xf32> -> vector<16x128xf32>
    %c0_9 = arith.constant 0 : index
    %c0_10 = arith.constant 0 : index
    %11 = vector.load %arg5[%c0_9, %c0_10] : memref<1x128xf32, #tpu.memory_space<vmem>>, vector<1x128xf32>
    %12 = vector.broadcast %11 : vector<1x128xf32> to vector<16x128xf32>
    %13 = arith.addf %10, %12 : vector<16x128xf32>
    %cst_11 = arith.constant 0.000000e+00 : f32
    %14 = vector.broadcast %cst_11 : f32 to vector<16x128xf32>
    %15 = arith.maximumf %13, %14 : vector<16x128xf32>
    %16 = arith.truncf %15 : vector<16x128xf32> to vector<16x128xbf16>
    %c0_12 = arith.constant 0 : index
    %c0_13 = arith.constant 0 : index
    %17 = vector.load %arg6[%c0_12, %c0_13] : memref<128x128xbf16, #tpu.memory_space<vmem>>, vector<128x128xbf16>
    %cst_14 = arith.constant dense<0.000000e+00> : vector<16x128xf32>
    %18 = tpu.matmul %16, %17, %cst_14 {dimension_numbers = #tpu.dot_dimension_numbers<[1], [0], [0], [1], [0, 0, 1, 1], [], []>} : vector<16x128xbf16>, vector<128x128xbf16>, vector<16x128xf32> -> vector<16x128xf32>
    %19 = vector.extract_strided_slice %18 {offsets = [0, 0], sizes = [16, 2], strides = [1, 1]} : vector<16x128xf32> to vector<16x2xf32>
    %c0_15 = arith.constant 0 : index
    %c0_16 = arith.constant 0 : index
    %20 = vector.load %arg7[%c0_15, %c0_16] : memref<1x2xf32, #tpu.memory_space<vmem>>, vector<1x2xf32>
    %21 = vector.broadcast %20 : vector<1x2xf32> to vector<16x2xf32>
    %22 = arith.addf %19, %21 : vector<16x2xf32>
    %c0_17 = arith.constant 0 : index
    %c0_18 = arith.constant 0 : index
    %23 = vector.load %arg8[%c0_17, %c0_18] : memref<16x2xf32, #tpu.memory_space<vmem>>, vector<16x2xf32>
    tpu.vector_store %arg8[%c0_17, %c0_18], %22 {strides = array<i32>} : memref<16x2xf32, #tpu.memory_space<vmem>>, vector<16x2xf32>,
    return
  }
  func.func @transform_0(%arg0: i32) -> (i32, i32) {
    %c0_i32 = arith.constant 0 : i32
    %c0_i32_0 = arith.constant 0 : i32
    return %arg0, %c0_i32 : i32, i32
  }
  func.func @transform_1(%arg0: i32) -> (i32, i32) {
    %c0_i32 = arith.constant 0 : i32
    %c0_i32_0 = arith.constant 0 : i32
    %c0_i32_1 = arith.constant 0 : i32
    return %c0_i32, %c0_i32_0 : i32, i32
  }
  func.func @transform_2(%arg0: i32) -> (i32, i32) {
    %c0_i32 = arith.constant 0 : i32
    %c0_i32_0 = arith.constant 0 : i32
    %c0_i32_1 = arith.constant 0 : i32
    return %c0_i32, %c0_i32_0 : i32, i32
  }
  func.func @transform_3(%arg0: i32) -> (i32, i32) {
    %c0_i32 = arith.constant 0 : i32
    %c0_i32_0 = arith.constant 0 : i32
    %c0_i32_1 = arith.constant 0 : i32
    return %c0_i32, %c0_i32_0 : i32, i32
  }
  func.func @transform_4(%arg0: i32) -> (i32, i32) {
    %c0_i32 = arith.constant 0 : i32
    %c0_i32_0 = arith.constant 0 : i32
    %c0_i32_1 = arith.constant 0 : i32
    return %c0_i32, %c0_i32_0 : i32, i32
  }
  func.func @transform_5(%arg0: i32) -> (i32, i32) {
    %c0_i32 = arith.constant 0 : i32
    %c0_i32_0 = arith.constant 0 : i32
    %c0_i32_1 = arith.constant 0 : i32
    return %c0_i32, %c0_i32_0 : i32, i32
  }
  func.func @transform_6(%arg0: i32) -> (i32, i32) {
    %c0_i32 = arith.constant 0 : i32
    %c0_i32_0 = arith.constant 0 : i32
    %c0_i32_1 = arith.constant 0 : i32
    return %c0_i32, %c0_i32_0 : i32, i32
  }
  func.func @transform_7(%arg0: i32) -> (i32, i32) {
    %c0_i32 = arith.constant 0 : i32
    %c0_i32_0 = arith.constant 0 : i32
    return %arg0, %c0_i32 : i32, i32
  }
}

</mosaic_0001>

<bundles_post_ra>
// kernel: tpu_custom_call.1
= control target key start
LH: loop header
LB: loop body
LE: loop exit
PB: predicated region body
PF: predicated region fallthrough
CT: control target
= control target key end

     0   :  { %12 = vsyncpa [#allocation3], 0  ;;  %s801_s0 = inlined_call_operand.hbm [shape: bf16[16,256], index: 0, kind: input, shape index: {}]   ;;  %s802_s1 = inlined_call_operand.hbm [shape: bf16[256,128], index: 1, kind: input, shape index: {}]   ;;  %s803_s2 = inlined_call_operand.vmem [shape: f32[1,128], index: 2, kind: input, shape index: {}]   ;;  %s804_s3 = inlined_call_operand.hbm [shape: bf16[128,128], index: 3, kind: input, shape index: {}]   ;;  %s805_s4 = inlined_call_operand.vmem [shape: f32[1,128], index: 4, kind: input, shape index: {}]   ;;  %s806_s5 = inlined_call_operand.hbm [shape: bf16[128,128], index: 5, kind: input, shape index: {}]   ;;  %s807_s6 = inlined_call_operand.vmem [shape: f32[1,2], index: 6, kind: input, shape index: {}]   ;;  %s808_s7 = inlined_call_operand.vmem [shape: f32[16,2], index: 7, kind: output, shape index: {}]  }
   0x1   :  { %13 = vsyncpa [#allocation5], 0  ;;  %s32_s26 = sshll.u32 %s802_s1, 4  ;;  %s33_s26 = int_to_ptr.hbm [resolvable:$true] %s32_s26 }
   0x2   :  { %14 = vsyncpa [#allocation8], 0  ;;  %s726_s27 = smov [#allocation4]   ;;  %s19_s8 = sshll.u32 %s801_s0, 4  ;;  %s20_s8 = int_to_ptr.hbm [resolvable:$true] %s19_s8 }
   0x3   :  { %s34_s28 = sshll.u32 %s726_s27, 4  ;;  %s727_s9 = smov 64   ;;  %s35_s28 = int_to_ptr.vmem [resolvable:$true] %s34_s28 }
   0x4   :  { %s728_s10 = smov 4   ;;  %s729_s11 = smov [#allocation2]  }
   0x5   :  { %40 = dma.hbm_to_vmem [thread:$0]  %s33_s26, 2048, %s35_s28, [#allocation5], %s727_s9, %s727_s9, %s728_s10  }
   0x6   :  { %s21_s12 = sshll.u32 %s729_s11, 4  ;;  %s730_s13 = smov 128   ;;  %s22_s12 = int_to_ptr.vmem [resolvable:$true] %s21_s12 }
   0x7   :  { %s731_s14 = smov 8   ;;  %s47_s16 = sshll.u32 %s804_s3, 4  ;;  %s48_s16 = int_to_ptr.hbm [resolvable:$true] %s47_s16 }
   0x8   :  { %27 = dma.hbm_to_vmem [thread:$0]  %s20_s8, 256, %s22_s12, [#allocation3], %s730_s13, %s730_s13, %s731_s14  }
   0x9   :  { %s732_s17 = smov [#allocation6]   ;;  %s62_s20 = sshll.u32 %s806_s5, 4  ;;  %s63_s20 = int_to_ptr.hbm [resolvable:$true] %s62_s20 }
   0xa   :  { %s49_s18 = sshll.u32 %s732_s17, 4  ;;  %s733_s21 = smov [#allocation7]   ;;  %s50_s18 = int_to_ptr.vmem [resolvable:$true] %s49_s18 }
   0xb   :  { %55 = dma.hbm_to_vmem [thread:$0]  %s48_s16, 1024, %s50_s18, [#allocation5], %s727_s9, %s727_s9, %s728_s10  }
   0xc   :  { %s64_s22 = sshll.u32 %s733_s21, 4  ;;  %s65_s22 = int_to_ptr.vmem [resolvable:$true] %s64_s22 }
   0xd   :  { %70 = dma.hbm_to_vmem [thread:$0]  %s63_s20, 1024, %s65_s22, [#allocation8], %s727_s9, %s727_s9, %s728_s10  }
   0xe   :  { %720 = dma.done.wait [#allocation3], 256  }
   0xf   :  { %721 = vsyncadd [#allocation3], 4294967040 }
  0x10   :  { %722 = dma.done.wait [#allocation5], 3072  }
  0x11   :  { %723 = vsyncadd [#allocation5], 4294964224 }
  0x12   :  { %724 = dma.done.wait [#allocation8], 1024  }
  0x13   :  { %725 = vsyncadd [#allocation8], 4294966272  ;;  %v588_v0 = vld [vmem:[#allocation4 + $0x38] sm:$0xff]  ;;  %v587_v2 = vld [vmem:[#allocation4 + $0x30] sm:$0xff]  ;;  %vm433_vm0 = vcmask 15360  }
  0x14   :  { %v596_v1 = vld [vmem:[#allocation4 + $0x78] sm:$0xff]  ;;  %233 = vmatpush.bf16.msra.mxu0 %v588_v0  ;;  %v595_v3 = vld [vmem:[#allocation4 + $0x70] sm:$0xff]  ;;  %v586_v4 = vld [vmem:[#allocation4 + $0x28] sm:$0xff] }
  0x15   :  { %247 = vmatpush.bf16.msra.mxu1 %v596_v1  ;;  %v594_v5 = vld [vmem:[#allocation4 + $0x68] sm:$0xff]  ;;  %v604_v6 = vld [vmem:[#allocation6 + $0x38] sm:$0xff]  ;;  %v603_v7 = vld [vmem:[#allocation6 + $0x30] sm:$0xff] }
  0x16   :  { %332 = vmatpush.bf16.msra.mxu2 %v604_v6  ;;  %v585_v8 = vld [vmem:[#allocation4 + $0x20] sm:$0xff]  ;;  %v602_v10 = vld [vmem:[#allocation6 + $0x28] sm:$0xff]  ;;  %v584_v11 = vld [vmem:[#allocation4 + $0x18] sm:$0xff] }
  0x17   :  { %v593_v9 = vld [vmem:[#allocation4 + $0x60] sm:$0xff]  ;;  %v592_v12 = vld [vmem:[#allocation4 + $0x58] sm:$0xff]  ;;  %v583_v14 = vld [vmem:[#allocation4 + $0x10] sm:$0xff] }
  0x18   :  { %234 = vmatpush.bf16.msra.mxu0 %v587_v2  ;;  %v601_v13 = vld [vmem:[#allocation6 + $0x20] sm:$0xff]  ;;  %v591_v15 = vld [vmem:[#allocation4 + $0x50] sm:$0xff]  ;;  %v582_v16 = vld [vmem:[#allocation4 + $0x8] sm:$0xff] }
  0x19   :  { %248 = vmatpush.bf16.msra.mxu1 %v595_v3  ;;  %v590_v17 = vld [vmem:[#allocation4 + $0x48] sm:$0xff]  ;;  %v581_v18 = vld [vmem:[#allocation4] sm:$0xff]  ;;  %v445_v20 = vld [vmem:[#allocation2] sm:$0xf] }
  0x1a   :  { %333 = vmatpush.bf16.msra.mxu2 %v603_v7  ;;  %v589_v19 = vld [vmem:[#allocation4 + $0x40] sm:$0xff]  ;;  %v580_v21 = vld [vmem:[#allocation2 + $0x4] sm:$0xf0]  ;;  %v579_v22 = vld [vmem:[#allocation2 + $0x4] sm:$0xf] }
  0x1b   :  { %v447_v23 = vld [vmem:[#allocation2 + $0x8] sm:$0xf0]  ;;  %v446_v24 = vor.u32 %v580_v21, %v445_v20  ;;  %v599_v27 = vld [vmem:[#allocation6 + $0x10] sm:$0xff]  ;;  %v598_v28 = vld [vmem:[#allocation6 + $0x8] sm:$0xff] }
  0x1c   :  { %235 = vmatpush.bf16.msra.mxu0 %v586_v4  ;;  %v450_v25 = vor.u32 %v579_v22, %v447_v23  ;;  %v600_v26 = vld [vmem:[#allocation6 + $0x18] sm:$0xff]  ;;  %v597_v29 = vld [vmem:[#allocation6] sm:$0xff]  ;;  %v611_v31 = vld [vmem:[#allocation7 + $0x30] sm:$0xff] }
  0x1d   :  { %249 = vmatpush.bf16.msra.mxu1 %v594_v5  ;;  %v612_v30 = vld [vmem:[#allocation7 + $0x38] sm:$0xff]  ;;  %v610_v32 = vld [vmem:[#allocation7 + $0x28] sm:$0xff]  ;;  %v609_v33 = vld [vmem:[#allocation7 + $0x20] sm:$0xff] }
  0x1e   :  { %334 = vmatpush.bf16.msra.mxu2 %v602_v10  ;;  %413 = vmatpush.bf16.msra.mxu3 %v612_v30  ;;  %v621_v36 = vld [vmem:[%s803_s2] ss:$0 sm:$0xff]  ;;  %v608_v46 = vld [vmem:[#allocation7 + $0x18] sm:$0xff]  ;;  %v606_v48 = vld [vmem:[#allocation7 + $0x8] sm:$0xff] }
  0x1f   :  { %v607_v47 = vld [vmem:[#allocation7 + $0x10] sm:$0xff]  ;;  %v605_v49 = vld [vmem:[#allocation7] sm:$0xff] }
  0x20   :  { %236 = vmatpush.bf16.msra.mxu0 %v585_v8  ;;  %v622_v51 = vld [vmem:[%s805_s4] ss:$0 sm:$0xff] }
  0x21   :  { %250 = vmatpush.bf16.msra.mxu1 %v593_v9  ;;  %v623_v58 = vld [vmem:[%s807_s6] ss:$0 sm:$0xff] }
  0x22   :  { %335 = vmatpush.bf16.msra.mxu2 %v601_v13  ;;  %414 = vmatpush.bf16.msra.mxu3 %v611_v31 }
  0x24   :  { %237 = vmatpush.bf16.msra.mxu0 %v584_v11 }
  0x25   :  { %251 = vmatpush.bf16.msra.mxu1 %v592_v12 }
  0x26   :  { %336 = vmatpush.bf16.msra.mxu2 %v600_v26  ;;  %415 = vmatpush.bf16.msra.mxu3 %v610_v32 }
  0x28   :  { %238 = vmatpush.bf16.msra.mxu0 %v583_v14 }
  0x29   :  { %252 = vmatpush.bf16.msra.mxu1 %v591_v15 }
  0x2a   :  { %337 = vmatpush.bf16.msra.mxu2 %v599_v27  ;;  %416 = vmatpush.bf16.msra.mxu3 %v609_v33 }
  0x2c   :  { %239 = vmatpush.bf16.msra.mxu0 %v582_v16 }
  0x2d   :  { %253 = vmatpush.bf16.msra.mxu1 %v590_v17 }
  0x2e   :  { %338 = vmatpush.bf16.msra.mxu2 %v598_v28  ;;  %417 = vmatpush.bf16.msra.mxu3 %v608_v46 }
  0x30   :  { %240 = vmatpush.bf16.msra.mxu0 %v581_v18 }
  0x31   :  { %254 = vmatpush.bf16.msra.mxu1 %v589_v19 }
  0x32   :  { %339 = vmatpush.bf16.msra.mxu2 %v597_v29  ;;  %418 = vmatpush.bf16.msra.mxu3 %v607_v47 }
  0x33   :  { %241 = vmatmul.bf16.vlgmr.msra.gmra.mxu0 %v446_v24 }
  0x34   :  { %255 = vmatmul.bf16.vlgmr.msra.gmra.mxu1 %v450_v25 }
  0x36   :  { %419 = vmatpush.bf16.msra.mxu3 %v606_v48 }
  0x3a   :  { %420 = vmatpush.bf16.msra.mxu3 %v605_v49 }
  0xb0   :  { %v242_v34 = vpop.f32.mrf.mxu0 }
  0xb1   :  { %v256_v35 = vpop.f32.mrf.mxu1  ;;  %v243_v37 = vadd.f32 %v621_v36, %v242_v34 }
  0xb3   :  { %v257_v39 = vadd.f32 %v256_v35, %v243_v37 }
  0xb5   :  { %v261_v43 = vmax.f32 %v257_v39, 0.0 }
  0xb8   :  { %v244_v38 = vpop.f32.mrf.mxu0 }
  0xb9   :  { %v245_v40 = vadd.f32 %v621_v36, %v244_v38  ;;  %v258_v41 = vpop.f32.mrf.mxu1 }
  0xbb   :  { %v259_v42 = vadd.f32 %v258_v41, %v245_v40 }
  0xbd   :  { %v262_v44 = vmax.f32 %v259_v42, 0.0 }
  0xbf   :  { %v263_v45 = vpack.c.bf16 %v262_v44, %v261_v43 }
  0xc1   :  { %340 = vmatmul.bf16.vlgmr.msra.gmra.mxu2 %v263_v45 }
 0x144   :  { %v341_v50 = vpop.f32.mrf.mxu2 }
 0x145   :  { %v342_v52 = vadd.f32 %v622_v51, %v341_v50 }
 0x147   :  { %v346_v55 = vmax.f32 %v342_v52, 0.0 }
 0x14c   :  { %v343_v53 = vpop.f32.mrf.mxu2 }
 0x14d   :  { %v344_v54 = vadd.f32 %v622_v51, %v343_v53 }
 0x14f   :  { %v347_v56 = vmax.f32 %v344_v54, 0.0 }
 0x151   :  { %v348_v57 = vpack.c.bf16 %v347_v56, %v346_v55 }
 0x153   :  { %421 = vmatmul.bf16.vlgmr.msra.gmra.mxu3 %v348_v57 }
 0x1d6   :  { %v422_v59 = vpop.f32.mrf.mxu3 }
 0x1d7   :  { %v431_v60 = vadd.f32 %v623_v58, %v422_v59 }
 0x1d9   :  { %434 = vst.msk [vmem:[%s808_s7] sm:$0xff] %vm433_vm0, %v431_v60 }
 0x1de   :  { %v424_v61 = vpop.f32.mrf.mxu3 }
 0x1df   :  { %v432_v62 = vadd.f32 %v623_v58, %v424_v61 }
 0x1e1   :  { %435 = vst.msk [vmem:[%s808_s7 + $0x8] sm:$0xff] %vm433_vm0, %v432_v62 }
 0x1e2   :  { %440 = vsyncpa [#allocation3], 1 }
 0x1e3   :  { %441 = vsyncpa [#allocation5], 1 }
 0x1e4   :  { %442 = vsyncpa [#allocation8], 1 }

</bundles_post_ra>
